<compile_context>
chip_gen: v7x
topology: tpu7x:2x2x1
jax: 0.10.0
libtpu: 0.0.40
codegen_flags: <defaults>
</compile_context>

<pallas_src>
import jax
import jax.numpy as jnp
from jax import lax
from jax.experimental import pallas as pl
from jax.experimental.pallas import tpu as pltpu

K = 3  # MaxPool2d(kernel_size=3) -> stride=3, padding=0, ceil_mode=False


def _maxpool_kernel(x_ref, o_ref):
    # x_ref: (Bc, H, W) input block (native dtype); o_ref: (Bc, OH, OW) output block.
    bc, h, w = x_ref.shape
    _, oh, ow = o_ref.shape

    # ---- Stage 1: pool along H.  Non-overlapping windows -> three sublane-strided slab
    # reads cover every needed row exactly once; pure VPU maxima over whole slabs.
    r0 = x_ref[:, pl.ds(0, oh, stride=K), :]
    r1 = x_ref[:, pl.ds(1, oh, stride=K), :]
    r2 = x_ref[:, pl.ds(2, oh, stride=K), :]
    rm = jnp.maximum(jnp.maximum(r0, r1), r2)                       # (Bc, OH, W)

    # ---- Stage 2: pool along W.  Collapse (planes, rows) into one big-M matrix so the MXU
    # M dimension is filled, then gather the three window taps with 0/1 selection matmuls
    # (sel_r[w, j] = 1 iff w == 3j + r) and combine with max.  Exact selection for finite
    # inputs; f32 accumulation.
    mflat = rm.reshape(bc * oh, w)                                  # (Bc*OH, W)
    wi = lax.broadcasted_iota(jnp.int32, (w, ow), 0)
    ji3 = K * lax.broadcasted_iota(jnp.int32, (w, ow), 1)

    acc = jnp.dot(mflat, (wi == ji3).astype(mflat.dtype),
                  preferred_element_type=jnp.float32)
    acc = jnp.maximum(acc, jnp.dot(mflat, (wi == ji3 + 1).astype(mflat.dtype),
                                   preferred_element_type=jnp.float32))
    acc = jnp.maximum(acc, jnp.dot(mflat, (wi == ji3 + 2).astype(mflat.dtype),
                                   preferred_element_type=jnp.float32))

    # Single full-block store.
    o_ref[...] = acc.reshape(bc, oh, ow).astype(o_ref.dtype)


def _choose_block(num_planes, plane_bytes, budget_bytes=8 << 20):
    """Planes per grid step: as many as fit the per-block input budget (8 MiB).

    Total footprint (2x double-buffered input + intermediates + 2x output) stays ~3x the
    input budget, well under v7x's 64 MiB VMEM with vmem_limit_bytes below.  No divisor
    search (Pallas pads/clips a ragged last block); keep >= 2 grid steps when possible so
    both v7x TensorCores get work.
    """
    bc = max(1, min(num_planes, budget_bytes // max(plane_bytes, 1)))
    if num_planes >= 2:
        bc = min(bc, -(-num_planes // 2))   # ceil(B/2): at least two grid steps
    return int(bc)


def maxpool2d_pallas(x):
    """MaxPool2d(kernel_size=3, stride=3, padding=0, ceil_mode=False) on NCHW input."""
    N, C, H, W = x.shape
    if H < K or W < K:
        raise ValueError(f"MaxPool2d(kernel_size=3) needs H,W >= 3, got H={H}, W={W}")
    if not jnp.issubdtype(x.dtype, jnp.floating):
        raise NotImplementedError("maxpool2d_pallas supports floating-point inputs only")

    OH, OW = H // K, W // K
    B = N * C
    xb = x.reshape(B, H, W)                     # free: merges leading dims only

    itemsize = jnp.dtype(x.dtype).itemsize
    Bc = _choose_block(B, H * W * itemsize)
    grid = (pl.cdiv(B, Bc),)

    grid_spec = pltpu.PrefetchScalarGridSpec(
        num_scalar_prefetch=0,
        grid=grid,
        # Blocks keep the full H, W extents (last two dims == array dims), so the (8, 128)
        # block-shape constraint is satisfied for any plane size.
        in_specs=[pl.BlockSpec((Bc, H, W), lambda g: (g, 0, 0))],
        out_specs=pl.BlockSpec((Bc, OH, OW), lambda g: (g, 0, 0)),
    )

    out = pl.pallas_call(
        _maxpool_kernel,
        out_shape=jax.ShapeDtypeStruct((B, OH, OW), x.dtype),
        grid_spec=grid_spec,
        compiler_params=pltpu.CompilerParams(
            dimension_semantics=("parallel",),
            vmem_limit_bytes=56 * 1024 * 1024,   # safe on v7x (64 MiB) and v5e/v6e (128 MiB)
        ),
    )(xb)
    return out.reshape(N, C, OH, OW)


def maxpool2d_ref(x):
    """Pure-JAX reference for correctness check."""
    N, C, H, W = x.shape
    OH, OW = H // K, W // K
    xc = x[:, :, :OH * K, :OW * K].reshape(N, C, OH, K, OW, K)
    return xc.max(axis=(3, 5))


if __name__ == "__main__":
    key = jax.random.PRNGKey(0)
    x = jax.random.normal(key, (2, 4, 16, 16), dtype=jnp.float32)

    out = maxpool2d_pallas(x)
    jax.block_until_ready(out)

    ref = maxpool2d_ref(x)
    assert out.shape == (2, 4, 5, 5), out.shape
    assert out.dtype == x.dtype
    assert jnp.allclose(out, ref), "Pallas maxpool mismatch vs reference"

    print("KERNEL_OK")
</pallas_src>

<mosaic_0001>
module attributes {stable_mosaic.version = 11 : i64} {
  func.func @_maxpool_kernel(%arg0: i32, %arg1: memref<4x16x16xf32, #tpu.memory_space<vmem>>, %arg2: memref<4x5x5xf32, #tpu.memory_space<vmem>>) attributes {dimension_semantics = [#tpu.dimension_semantics<parallel>], iteration_bounds = array<i64: 2>, scalar_prefetch = 0 : i64, scratch_operands = 0 : i64, tpu.core_type = #tpu.core_type<tc>, window_params = [{transform_indices = @transform_0, window_bounds = array<i64: 4, 16, 16>}, {transform_indices = @transform_1, window_bounds = array<i64: 4, 5, 5>}]} {
    %c0 = arith.constant 0 : index
    %c0_0 = arith.constant 0 : index
    %c0_1 = arith.constant 0 : index
    %0 = tpu.strided_load %arg1[%c0, %c0_0, %c0_1] {strides = array<i32: 1, 3, 1>} : memref<4x16x16xf32, #tpu.memory_space<vmem>>, vector<4x5x16xf32>
    %c0_2 = arith.constant 0 : index
    %c1 = arith.constant 1 : index
    %c0_3 = arith.constant 0 : index
    %1 = tpu.strided_load %arg1[%c0_2, %c1, %c0_3] {strides = array<i32: 1, 3, 1>} : memref<4x16x16xf32, #tpu.memory_space<vmem>>, vector<4x5x16xf32>
    %c0_4 = arith.constant 0 : index
    %c2 = arith.constant 2 : index
    %c0_5 = arith.constant 0 : index
    %2 = tpu.strided_load %arg1[%c0_4, %c2, %c0_5] {strides = array<i32: 1, 3, 1>} : memref<4x16x16xf32, #tpu.memory_space<vmem>>, vector<4x5x16xf32>
    %3 = arith.maximumf %0, %1 : vector<4x5x16xf32>
    %4 = arith.maximumf %3, %2 : vector<4x5x16xf32>
    %5 = vector.shape_cast %4 : vector<4x5x16xf32> to vector<20x16xf32>
    %6 = tpu.iota {dimensions = array<i32: 0>} : vector<16x5xi32>
    %7 = tpu.iota {dimensions = array<i32: 1>} : vector<16x5xi32>
    %c3_i32 = arith.constant 3 : i32
    %8 = vector.broadcast %c3_i32 : i32 to vector<16x5xi32>
    %9 = arith.muli %8, %7 : vector<16x5xi32>
    %10 = arith.cmpi eq, %6, %9 : vector<16x5xi32>
    %11 = arith.extui %10 : vector<16x5xi1> to vector<16x5xi32>
    %12 = arith.sitofp %11 : vector<16x5xi32> to vector<16x5xf32>
    %cst = arith.constant dense<0.000000e+00> : vector<20x5xf32>
    %13 = tpu.matmul %5, %12, %cst {dimension_numbers = #tpu.dot_dimension_numbers<[1], [0], [0], [1], [0, 0, 1, 1], [], []>} : vector<20x16xf32>, vector<16x5xf32>, vector<20x5xf32> -> vector<20x5xf32>
    %c1_i32 = arith.constant 1 : i32
    %14 = vector.broadcast %c1_i32 : i32 to vector<16x5xi32>
    %15 = arith.addi %9, %14 : vector<16x5xi32>
    %16 = arith.cmpi eq, %6, %15 : vector<16x5xi32>
    %17 = arith.extui %16 : vector<16x5xi1> to vector<16x5xi32>
    %18 = arith.sitofp %17 : vector<16x5xi32> to vector<16x5xf32>
    %cst_6 = arith.constant dense<0.000000e+00> : vector<20x5xf32>
    %19 = tpu.matmul %5, %18, %cst_6 {dimension_numbers = #tpu.dot_dimension_numbers<[1], [0], [0], [1], [0, 0, 1, 1], [], []>} : vector<20x16xf32>, vector<16x5xf32>, vector<20x5xf32> -> vector<20x5xf32>
    %20 = arith.maximumf %13, %19 : vector<20x5xf32>
    %c2_i32 = arith.constant 2 : i32
    %21 = vector.broadcast %c2_i32 : i32 to vector<16x5xi32>
    %22 = arith.addi %9, %21 : vector<16x5xi32>
    %23 = arith.cmpi eq, %6, %22 : vector<16x5xi32>
    %24 = arith.extui %23 : vector<16x5xi1> to vector<16x5xi32>
    %25 = arith.sitofp %24 : vector<16x5xi32> to vector<16x5xf32>
    %cst_7 = arith.constant dense<0.000000e+00> : vector<20x5xf32>
    %26 = tpu.matmul %5, %25, %cst_7 {dimension_numbers = #tpu.dot_dimension_numbers<[1], [0], [0], [1], [0, 0, 1, 1], [], []>} : vector<20x16xf32>, vector<16x5xf32>, vector<20x5xf32> -> vector<20x5xf32>
    %27 = arith.maximumf %20, %26 : vector<20x5xf32>
    %28 = vector.shape_cast %27 : vector<20x5xf32> to vector<4x5x5xf32>
    %c0_8 = arith.constant 0 : index
    %c0_9 = arith.constant 0 : index
    %c0_10 = arith.constant 0 : index
    %29 = vector.load %arg2[%c0_8, %c0_9, %c0_10] : memref<4x5x5xf32, #tpu.memory_space<vmem>>, vector<4x5x5xf32>
    tpu.vector_store %arg2[%c0_8, %c0_9, %c0_10], %28 {strides = array<i32>} : memref<4x5x5xf32, #tpu.memory_space<vmem>>, vector<4x5x5xf32>,
    return
  }
  func.func @transform_0(%arg0: i32) -> (i32, i32, i32) {
    %c0_i32 = arith.constant 0 : i32
    %c0_i32_0 = arith.constant 0 : i32
    %c0_i32_1 = arith.constant 0 : i32
    return %arg0, %c0_i32, %c0_i32_0 : i32, i32, i32
  }
  func.func @transform_1(%arg0: i32) -> (i32, i32, i32) {
    %c0_i32 = arith.constant 0 : i32
    %c0_i32_0 = arith.constant 0 : i32
    %c0_i32_1 = arith.constant 0 : i32
    return %arg0, %c0_i32, %c0_i32_0 : i32, i32, i32
  }
}

</mosaic_0001>

<bundles_post_ra>
// kernel: tpu_custom_call.1
= control target key start
LH: loop header
LB: loop body
LE: loop exit
PB: predicated region body
PF: predicated region fallthrough
CT: control target
= control target key end

     0   :  { %6 = vsyncpa [#allocation3], 0  ;;  %s1602_s0 = inlined_call_operand.hbm [shape: f32[8,16,16], index: 0, kind: input, shape index: {}]   ;;  %s1603_s1 = inlined_call_operand.vmem [shape: f32[8,5,5], index: 1, kind: output, shape index: {}]  }
   0x1   :  { %8 = vsyncpa [#allocation3 + $0x1], 0  ;;  %s1336_s6 = smov 0   ;;  %s1338_s7 = smov 0  }
   0x2   :  { %s1340_s8 = smov 0   ;;  %s1342_s9 = smov 0  }
   0x3 LB: > { %s1089_s10 = sadd.s32 4294967295, %s1316_s9   ;;  %s1356_s11 = sadd.s32 1, %s1316_s9   ;;  %s1316_s9 = sphi %s1342_s9, %s1610_s9   ;;  %s1312_s8 = sphi %s1340_s8, %s1609_s8   ;;  %s1308_s7 = sphi %s1338_s7, %s1608_s7   ;;  %s1304_s6 = sphi %s1336_s6, %s1607_s6  }
   0x4   : > { %s18_s12 = ssub.s32 %s1316_s9, %s1356_s11  ;;  %s21_s13 = sadd.s32 1, %s1312_s8 }
   0x5   : > { %p19_p0 = scmp.eq.s32.totalorder %s18_s12, 0  ;;  %p28_p1 = scmp.ne.s32.totalorder %s1312_s8, %s1308_s7 }
   0x6   : > { %p29_p2 = scmp.eq.s32.totalorder %s1316_s9, 0  ;;  %p34_p3 = scmp.ne.s32.totalorder %s1308_s7, %s1304_s6 }
   0x7   : > { %s1366_s14 = scalar_select %p19_p0, %s1312_s8, %s21_s13  }
   0x8   : > { %p30_p4 = por %p29_p2, %p28_p1  ;;  %p35_p5 = scmp.eq.s32.totalorder %s1089_s10, 0 }
   0x9   : > { %p1212_p6 = scmp.lt.s32.totalorder %s1316_s9, 2  ;;  %s84_s16 = sand.u32 1, %s1312_s8  }
   0xa   : > { %p1371_p7 = por %p35_p5, %p34_p3  ;;  %s1093_s17 = sshll.u32 %s84_s16, 6 }
   0xb   : > { %s1140_s18 = sshll.u32 %s1316_s9, 10  ;;  %s88_s22 = scalar_lea.vmem [#allocation2], %s1093_s17 }
   0xc   : > { %s1380_s21 = scalar_lea.hbm %s1602_s0, %s1140_s18  ;;  %s96_s23 = sshll.u32 %s88_s22, 4  ;;  %s1382_s23 = int_to_ptr.vmem [resolvable:$true] %s96_s23 }
   0xd   : > { %p1384_p8 = pnand %p1212_p6, %p30_p4  ;;  %s1389_s25 = scalar_lea.sflag [#allocation3], %s84_s16 }
   0xe   : > { %s1252_s26 = scalar_lea.hbm %s1380_s21, 1024  ;;  %s1257_s29 = scalar_lea.hbm %s1602_s0, 2048 }
   0xf   : > { %p1253_p10 = scmp.ne.s32.totalorder %s1380_s21, %s1252_s26  ;;  %p1254_p11 = pneg %p1384_p8 }
  0x10   : > { %p1258_p0 = scmp.lt.u32.totalorder %s1380_s21, %s1602_s0  ;;  %p1259_p1 = scmp.lt.u32.totalorder %s1257_s29, %s1252_s26 }
  0x11   : > { %p1255_p12 = pnand %p1254_p11, %p1253_p10  ;;  %p1261_p3 = scmp.lt.u32.totalorder %s1252_s26, %s1380_s21 }
  0x12   : > { %p1260_p2 = por %p1259_p1, %p1258_p0 }
  0x13   : > { %p1256_p13 = pneg %p1255_p12 }
  0x14   : > { %p1262_p4 = por %p1261_p3, %p1260_p2 }
  0x16   : > { %p1263_p5 = pnand %p1262_p4, %p1256_p13 }
  0x18   : > { %1266 = shalt.err (!%p1263_p5)
}
  0x19   : > { %s1267_s3 = scalar_lea.vmem %s1382_s23, 1024  ;;  %s1318_s4 = smov [#allocation2]  }
  0x1a   : > { %p1268_p6 = scmp.ne.s32.totalorder %s1382_s23, %s1267_s3  ;;  %s1272_s5 = sshll.u32 %s1318_s4, 4  ;;  %s1273_s5 = int_to_ptr.vmem [resolvable:$false] %s1272_s5 }
  0x1b   : > { %s1274_s6 = scalar_lea.vmem %s1273_s5, 2048  ;;  %p1275_p9 = scmp.lt.s32.totalorder %s1382_s23, %s1273_s5 }
  0x1c   : > { %p1270_p10 = pnand %p1268_p6, %p1254_p11  ;;  %p1276_p0 = scmp.lt.s32.totalorder %s1274_s6, %s1267_s3 }
  0x1e   : > { %p1271_p12 = pneg %p1270_p10  ;;  %p1277_p1 = por %p1276_p0, %p1275_p9 }
  0x20   : > { %p1278_p2 = pnand %p1277_p1, %p1271_p12 }
  0x22   : > { %1281 = shalt.err (!%p1278_p2)
}
  0x23   : > { %s1319_s12 = smov 128   ;;  %s1320_s13 = smov 8  }
  0x24   : > { %1211 = dma.hbm_to_vmem [thread:$0]  (!%p1384_p8), %s1380_s21, 1024, %s1382_s23, %s1389_s25, %s1319_s12, %s1319_s12, %s1320_s13  }
  0x25   : > { %p104_p11 = scmp.lt.s32.totalorder %s1316_s9, 3  ;;  %p1606_p13 = scmp.ge.s32.totalorder %s1316_s9, 1 }
  0x27   : > { %p105_p3 = pnand %p1606_p13, %p104_p11 }
  0x28   : > { %s110_s16 = sand.u32 (!%p105_p3), 1, %s1308_s7  }
  0x29   : > { %108 = sbr.rel (%p105_p3) target bundleno = 328 (0x148), region = 24  ;;  %s1098_s17 = sshll.u32 (!%p105_p3), %s110_s16, 6 }
  0x2a   : > { %s111_s18 = scalar_lea.sflag (!%p105_p3), [#allocation3], %s110_s16  ;;  %s1421_s19 = scalar_lea.vmem (!%p105_p3), [#allocation2], %s1098_s17 }
  0x30   : > { %1299 = dma.done.wait (%p1371_p7), %s111_s18, 1024  }
  0x31   : > { %1301 = vsyncadd (%p1371_p7), %s111_s18, 4294966272  ;;  %v179_v0 = vlaneseq  ;;  %v1321_v1 = vmov 0.0|0.0   ;;  %v1322_v2 = vmov 1966171168   ;;  %vm1323_vm0 = vmmov 0   ;;  %s1099_s15 = sshll.u32 %s1089_s10, 2 }
  0x32   : > { %1204 = vmatprep.subr.bf16.mxu1 %v1321_v1  ;;  %v177_v3 = vunpack.c.l.s4 %v1322_v2  ;;  %1195 = vmatprep.subr.bf16.mxu0 %v1321_v1  ;;  %v1324_v6 = vmov 0.0   ;;  %v1101_v10 = vld [vmem:[%s1421_s19 + $0x10] ss:$3 sm:$0x1f]  ;;  %v1325_v12 = vmov 1.0|1.0  }
  0x33   : > { %v1427_v4 = vshrl.u32 %v179_v0, 7  ;;  %v335_v5 = vand.u32 127, %v179_v0  ;;  %1163 = vmatprep.mubr.msk.f32.mxu1 %vm1323_vm0, %v1324_v6  ;;  %1160 = vmatprep.mubr.msk.f32.mxu0 %vm1323_vm0, %v1324_v6  ;;  %v1102_v11 = vld [vmem:[%s1421_s19 + $0x20] ss:$3 sm:$0x1f]  ;;  %vm465_vm6 = vcmask 130048  }
  0x34   : > { %v178_v9 = vunpack.c.0.s8 %v177_v3  ;;  %v1103_v13 = vld [vmem:[%s1421_s19 + $0x30] ss:$3 sm:$0x1f]  ;;  %v1105_v14 = vld [vmem:[%s1421_s19 + $0x11] ss:$3 sm:$0x1f] }
  0x35   : > { %v1434_v7 = vadd.s32 8, %v1427_v4  ;;  %v1436_v8 = vmul.u32 3, %v335_v5  ;;  %v1106_v16 = vld [vmem:[%s1421_s19 + $0x21] ss:$3 sm:$0x1f]  ;;  %v164_v18 = vmax.f32 %v1101_v10, %v1105_v14  ;;  %p135_p7 = scmp.lt.s32.totalorder %s1099_s15, 7 }
  0x36   : > { %v1449_v15 = vsub.s32 %v178_v9, %v1427_v4  ;;  %v1107_v17 = vld [vmem:[%s1421_s19 + $0x31] ss:$3 sm:$0x1f]  ;;  %v1109_v19 = vld [vmem:[%s1421_s19 + $0x12] ss:$3 sm:$0x1f]  ;;  %v165_v21 = vmax.f32 %v1102_v11, %v1106_v16 }
  0x37   : > { %vm337_vm1 = vcmp.eq.s32.totalorder %v1427_v4, %v1436_v8  ;;  %vm338_vm2 = vcmp.eq.s32.totalorder %v1434_v7, %v1436_v8  ;;  %v1110_v20 = vld [vmem:[%s1421_s19 + $0x22] ss:$3 sm:$0x1f]  ;;  %v166_v22 = vmax.f32 %v1103_v13, %v1107_v17  ;;  %v1111_v23 = vld [vmem:[%s1421_s19 + $0x32] ss:$3 sm:$0x1f]  ;;  %v168_v24 = vmax.f32 %v164_v18, %v1109_v19 }
  0x38   : > { %vm1196_vm3 = vmpackc.low %vm338_vm2, %vm337_vm1  ;;  %v140_v25 = vld [vmem:[%s1421_s19] ss:$3 sm:$0x1f]  ;;  %v169_v26 = vmax.f32 %v165_v21, %v1110_v20  ;;  %v1104_v28 = vld [vmem:[%s1421_s19 + $0x1] ss:$3 sm:$0x1f] }
  0x39   : > { %1205 = vmatpush3.bf16.msk.msra.mxu1 %vm1196_vm3, %v1325_v12  ;;  %1197 = vmatpush3.bf16.msk.msra.mxu0 %vm1196_vm3, %v1325_v12  ;;  %v170_v27 = vmax.f32 %v166_v22, %v1111_v23  ;;  %v1108_v29 = vld [vmem:[%s1421_s19 + $0x2] ss:$3 sm:$0x1f]  ;;  %v214_v30 = vcombine.high %v168_v24, %v168_v24  ;;  %v221_v31 = vrot.slane %v168_v24, %v1449_v15  ;;  %v1461_v32 = vadd.s32 1, %v1436_v8  ;;  %s1612_s15 = smov (!%p135_p7, %s1099_s15), 7 }
  0x3a   : > { %1198 = vmatprep.subr.bf16.mxu1 %v1321_v1  ;;  %1201 = vmatprep.subr.bf16.mxu0 %v1321_v1  ;;  %v163_v33 = vmax.f32 %v140_v25, %v1104_v28  ;;  %v253_v34 = vcombine.high %v169_v26, %v169_v26  ;;  %v260_v35 = vrot.slane %v169_v26, %v1449_v15  ;;  %s1100_s9 = sshll.u32 %s1612_s15, 3  ;;  %vm1017_vm11 = vcmask 36864  }
  0x3b   : > { %v299_v36 = vrot.slane %v170_v27, %v1449_v15  ;;  %v292_v37 = vcombine.high %v170_v27, %v170_v27  ;;  %v228_v38 = vrot.slane %v214_v30, %v1449_v15  ;;  %v229_v39 = vcombine.high %v221_v31, %v221_v31  ;;  %s1565_s21 = scalar_lea.vmem %s1603_s1, %s1100_s9 }
  0x3c   : > { %v167_v40 = vmax.f32 %v163_v33, %v1108_v29  ;;  %v236_v41 = vrot.slane %v221_v31, %v1449_v15  ;;  %v267_v42 = vrot.slane %v253_v34, %v1449_v15  ;;  %v268_v43 = vcombine.high %v260_v35, %v260_v35 }
  0x3d   : > { %v275_v44 = vrot.slane %v260_v35, %v1449_v15  ;;  %v314_v45 = vrot.slane %v299_v36, %v1449_v15  ;;  %v243_v46 = vrot.slane %v228_v38, %v1449_v15  ;;  %v250_v47 = vrot.slane %v229_v39, %v1449_v15 }
  0x3e   : > { %v306_v48 = vrot.slane %v292_v37, %v1449_v15  ;;  %v307_v49 = vcombine.high %v299_v36, %v299_v36  ;;  %v282_v50 = vrot.slane %v267_v42, %v1449_v15  ;;  %v289_v51 = vrot.slane %v268_v43, %v1449_v15 }
  0x3f   : > { %v329_v52 = vcombine.high %v314_v45, %v314_v45  ;;  %v175_v53 = vcombine.high %v167_v40, %v167_v40  ;;  %v252_v54 = vcombine.high %v250_v47, %v250_v47  ;;  %v182_v57 = vrot.slane %v167_v40, %v1449_v15 }
  0x40   : > { %v321_v55 = vrot.slane %v306_v48, %v1449_v15  ;;  %v328_v56 = vrot.slane %v307_v49, %v1449_v15  ;;  %v393_v58 = vcombine.low %v275_v44, %v289_v51  ;;  %v1115_v59 = vcombine.high %v275_v44, %v289_v51 }
  0x41   : > { %v395_v60 = vcombine.low %v282_v50, %v314_v45  ;;  %v189_v61 = vrot.slane %v175_v53, %v1449_v15  ;;  %v392_v62 = vcombine.low %v252_v54, %v243_v46  ;;  %v190_v1 = vcombine.high %v182_v57, %v182_v57 }
  0x42   : > { %v330_v63 = vcombine.high %v328_v56, %v328_v56  ;;  %v441_v0 = vcombine.low %v328_v56, %v329_v52  ;;  %v409_v2 = vrot.slane %v393_v58, %v1449_v15  ;;  %v416_v3 = vrot.slane %v1115_v59, %v1449_v15 }
  0x43   : > { %v423_v5 = vrot.slane %v395_v60, %v1449_v15  ;;  %v197_v9 = vrot.slane %v182_v57, %v1449_v15  ;;  %v402_v10 = vrot.slane %v392_v62, %v1449_v15  ;;  %v204_v14 = vrot.slane %v189_v61, %v1449_v15 }
  0x44   : > { %v442_v11 = vcombine.low %v330_v63, %v321_v55  ;;  %v449_v13 = vrot.slane %v441_v0, %v1449_v15  ;;  %vm553_vm4 = vcmp.eq.s32.totalorder %v1427_v4, %v1461_v32  ;;  %v211_v17 = vrot.slane %v190_v1, %v1449_v15 }
  0x45   : > { %v425_v16 = vcombine.low %v416_v3, %v423_v5  ;;  %v251_v18 = vcombine.high %v236_v41, %v236_v41  ;;  %v424_v19 = vcombine.low %v402_v10, %v409_v2  ;;  %vm554_vm5 = vcmp.eq.s32.totalorder %v1434_v7, %v1461_v32 }
  0x46   : > { %v456_v20 = vrot.slane %v442_v11, %v1449_v15  ;;  %v345_v21 = vcombine.low %v204_v14, %v236_v41  ;;  %v343_v23 = vcombine.low %v197_v9, %v211_v17  ;;  %v1114_v24 = vcombine.high %v197_v9, %v211_v17  ;;  %vm1199_vm7 = vmpackc.low %vm554_vm5, %vm553_vm4 }
  0x47   : > { %v439_v22 = vrot.slane %v425_v16, %v1449_v15  ;;  %v346_v25 = vcombine.low %v250_v47, %v251_v18  ;;  %v432_v26 = vrot.slane %v424_v19, %v1449_v15  ;;  %v642_v29 = vadd.s32 2, %v1436_v8 }
  0x48   : > { %v457_v27 = vcombine.low %v449_v13, %v456_v20  ;;  %v367_v28 = vrot.slane %v345_v21, %v1449_v15  ;;  %v353_v30 = vrot.slane %v343_v23, %v1449_v15  ;;  %v360_v31 = vrot.slane %v1114_v24, %v1449_v15 }
  0x49   : > { %v374_v33 = vrot.slane %v346_v25, %v1449_v15  ;;  %v440_v34 = vcombine.low %v432_v26, %v439_v22  ;;  %vm643_vm8 = vcmp.eq.s32.totalorder %v1427_v4, %v642_v29  ;;  %vm644_vm9 = vcmp.eq.s32.totalorder %v1434_v7, %v642_v29 }
  0x4a   : > { %v375_v35 = vcombine.low %v353_v30, %v360_v31  ;;  %v464_v8 = vrot.slane %v457_v27, %v1449_v15  ;;  %vm1202_vm10 = vmpackc.low %vm644_vm9, %vm643_vm8 }
  0x4b   : > { %v376_v36 = vcombine.low %v367_v28, %v374_v33  ;;  %1164 = vmatmul.mubr.msk.f32.vlgmr.msra.gmra.mrb[0].mxu1 %vm465_vm6, %v440_v34 }
  0x4c   : > { %1200 = vmatpush3.bf16.msk.msra.mxu1 %vm1199_vm7, %v1325_v12  ;;  %1166 = vmatprep.mubr.msk.f32.mxu1 %vm1323_vm0, %v1324_v6  ;;  %v383_v37 = vrot.slane %v375_v35, %v1449_v15 }
  0x4d   : > { %v390_v32 = vrot.slane %v376_v36, %v1449_v15 }
  0x4f   : > { %v391_v38 = vcombine.low %v383_v37, %v390_v32  ;;  %1167 = vmatmul.mubr.msk.f32.gmra.mrb[2].mxu1 %vm465_vm6, %v464_v8 }
  0x50   : > { %1173 = vmatprep.mubr.msk.f32.mxu1 %vm1323_vm0, %v1324_v6 }
  0x51   : > { %1161 = vmatmul.mubr.msk.f32.vlgmr.msra.gmra.mrb[0].mxu0 %vm465_vm6, %v391_v38 }
  0x52   : > { %1203 = vmatpush3.bf16.msk.msra.mxu0 %vm1202_vm10, %v1325_v12  ;;  %1186 = vmatprep.mubr.msk.f32.mxu0 %vm1323_vm0, %v1324_v6 }
  0x53   : > { %1174 = vmatmul.mubr.msk.f32.vlgmr.msra.gmra.mrb[4].mxu1 %vm465_vm6, %v391_v38 }
  0x54   : > { %1176 = vmatprep.mubr.msk.f32.mxu1 %vm1323_vm0, %v1324_v6 }
  0x55   : > { %1187 = vmatmul.mubr.msk.f32.vlgmr.msra.gmra.mrb[2].mxu0 %vm465_vm6, %v391_v38 }
  0x56   : > { %1189 = vmatprep.mubr.msk.f32.mxu0 %vm1323_vm0, %v1324_v6 }
  0x57   : > { %1177 = vmatmul.mubr.msk.f32.gmra.mrb[6].mxu1 %vm465_vm6, %v440_v34 }
  0x58   : > { %1179 = vmatprep.mubr.msk.f32.mxu1 %vm1323_vm0, %v1324_v6 }
  0x59   : > { %1190 = vmatmul.mubr.msk.f32.gmra.mrb[4].mxu0 %vm465_vm6, %v440_v34 }
  0x5a   : > { %1192 = vmatprep.mubr.msk.f32.mxu0 %vm1323_vm0, %v1324_v6 }
  0x5b   : > { %1180 = vmatmul.mubr.msk.f32.gmra.mrb[8].mxu1 %vm465_vm6, %v464_v8 }
  0x5d   : > { %1193 = vmatmul.mubr.msk.f32.gmra.mrb[6].mxu0 %vm465_vm6, %v464_v8 }
 0x11e   : > { %v543_v4 = vpop.f32.mrb[0].mxu1 }
 0x11f   : > { %v1165_v7 = vpop.f32.mrb[1].mxu1 }
 0x122   : > { %v548_v12 = vpop.f32.mrb[2].mxu1 }
 0x123   : > { %v1168_v40 = vpop.f32.mrb[3].mxu1 }
 0x124   : > { %v538_v39 = vpop.f32.mrb[0].mxu0 }
 0x125   : > { %v1162_v41 = vpop.f32.mrb[1].mxu0 }
 0x126   : > { %v625_v42 = vpop.f32.mrb[4].mxu1 }
 0x127   : > { %v639_v43 = vmax.f32 %v538_v39, %v625_v42  ;;  %v1175_v44 = vpop.f32.mrb[5].mxu1 }
 0x128   : > { %v715_v45 = vpop.f32.mrb[2].mxu0 }
 0x129   : > { %v1188_v46 = vpop.f32.mrb[3].mxu0  ;;  %v729_v47 = vmax.f32 %v639_v43, %v715_v45 }
 0x12a   : > { %v630_v48 = vpop.f32.mrb[6].mxu1 }
 0x12b   : > { %v735_v6 = vcombine.high %v729_v47, %v729_v47  ;;  %v742_v49 = vrot.slane %v729_v47, %v1449_v15  ;;  %v640_v50 = vmax.f32 %v543_v4, %v630_v48  ;;  %v1178_v51 = vpop.f32.mrb[7].mxu1 }
 0x12c   : > { %v720_v52 = vpop.f32.mrb[4].mxu0 }
 0x12d   : > { %v1191_v53 = vpop.f32.mrb[5].mxu0  ;;  %v749_v54 = vrot.slane %v735_v6, %v1449_v15  ;;  %v750_v55 = vcombine.high %v742_v49, %v742_v49  ;;  %v730_v56 = vmax.f32 %v640_v50, %v720_v52  ;;  %v758_v57 = vrot.slane %v742_v49, %v1449_v15 }
 0x12e   : > { %v635_v58 = vpop.f32.mrb[8].mxu1 }
 0x12f   : > { %v751_v59 = vcombine.high %v749_v54, %v749_v54  ;;  %v765_v60 = vrot.slane %v749_v54, %v1449_v15  ;;  %v772_v61 = vrot.slane %v750_v55, %v1449_v15  ;;  %v784_v62 = vcombine.high %v730_v56, %v730_v56  ;;  %v1181_v63 = vpop.f32.mrb[9].mxu1 }
 0x130   : > { %v725_v0 = vpop.f32.mrb[6].mxu0  ;;  %v791_v1 = vrot.slane %v730_v56, %v1449_v15  ;;  %v641_v2 = vmax.f32 %v548_v12, %v635_v58 }
 0x131   : > { %v1194_v3 = vpop.f32.mrb[7].mxu0  ;;  %v779_v5 = vrot.slane %v751_v59, %v1449_v15  ;;  %v781_v9 = vcombine.high %v765_v60, %v765_v60  ;;  %v857_v10 = vcombine.low %v758_v57, %v772_v61  ;;  %v1135_v11 = vcombine.high %v758_v57, %v772_v61 }
 0x132   : > { %v879_v13 = vrot.slane %v765_v60, %v1449_v15  ;;  %v798_v14 = vrot.slane %v784_v62, %v1449_v15  ;;  %v799_v16 = vcombine.high %v791_v1, %v791_v1  ;;  %v807_v17 = vrot.slane %v791_v1, %v1449_v15 }
 0x133   : > { %v865_v18 = vrot.slane %v857_v10, %v1449_v15  ;;  %v872_v19 = vrot.slane %v1135_v11, %v1449_v15  ;;  %v896_v20 = vcombine.low %v779_v5, %v781_v9  ;;  %v783_v21 = vcombine.high %v779_v5, %v779_v5 }
 0x134   : > { %v800_v22 = vcombine.high %v798_v14, %v798_v14  ;;  %v814_v23 = vrot.slane %v798_v14, %v1449_v15  ;;  %v821_v24 = vrot.slane %v799_v16, %v1449_v15  ;;  %v894_v26 = vrot.slane %v879_v13, %v1449_v15 }
 0x135   : > { %v880_v25 = vcombine.low %v865_v18, %v872_v19  ;;  %v897_v27 = vcombine.low %v783_v21, %v807_v17  ;;  %v731_v28 = vmax.f32 %v641_v2, %v725_v0  ;;  %v904_v31 = vrot.slane %v896_v20, %v1449_v15 }
 0x136   : > { %v828_v29 = vrot.slane %v800_v22, %v1449_v15  ;;  %v830_v30 = vcombine.high %v814_v23, %v814_v23  ;;  %v1136_v33 = vcombine.high %v807_v17, %v821_v24  ;;  %v918_v36 = vrot.slane %v821_v24, %v1449_v15 }
 0x137   : > { %v887_v34 = vrot.slane %v880_v25, %v1449_v15  ;;  %v911_v35 = vrot.slane %v897_v27, %v1449_v15  ;;  %v839_v8 = vrot.slane %v731_v28, %v1449_v15 }
 0x138   : > { %v936_v37 = vcombine.low %v814_v23, %v828_v29  ;;  %v832_v4 = vcombine.high %v828_v29, %v828_v29  ;;  %v943_v12 = vrot.slane %v1136_v33, %v1449_v15  ;;  %v957_v40 = vrot.slane %v830_v30, %v1449_v15 }
 0x139   : > { %v895_v32 = vcombine.low %v887_v34, %v894_v26  ;;  %v919_v38 = vcombine.low %v904_v31, %v911_v35  ;;  %v840_v7 = vcombine.high %v839_v8, %v839_v8  ;;  %v847_v41 = vrot.slane %v839_v8, %v1449_v15 }
 0x13a   : > { %v950_v39 = vrot.slane %v936_v37, %v1449_v15  ;;  %v933_v43 = vrot.slane %v918_v36, %v1449_v15  ;;  %v972_v50 = vrot.slane %v957_v40, %v1449_v15 }
 0x13b   : > { %1018 = vst.msk [vmem:[%s1565_s21] sm:$0x1f] %vm1017_vm11, %v895_v32  ;;  %v926_v42 = vrot.slane %v919_v38, %v1449_v15  ;;  %v854_v44 = vrot.slane %v840_v7, %v1449_v15  ;;  %v855_v46 = vcombine.high %v847_v41, %v847_v41  ;;  %v974_v47 = vcombine.low %v832_v4, %v847_v41 }
 0x13c   : > { %v958_v45 = vcombine.low %v943_v12, %v950_v39 }
 0x13d   : > { %v934_v48 = vcombine.low %v926_v42, %v933_v43  ;;  %v856_v6 = vcombine.high %v854_v44, %v854_v44  ;;  %v975_v51 = vcombine.low %v854_v44, %v855_v46  ;;  %v982_v52 = vrot.slane %v974_v47, %v1449_v15 }
 0x13e   : > { %v965_v49 = vrot.slane %v958_v45, %v1449_v15 }
 0x13f   : > { %1019 = vst.msk [vmem:[%s1565_s21 + $0x8] sm:$0x1f] %vm1017_vm11, %v934_v48  ;;  %v989_v54 = vrot.slane %v975_v51, %v1449_v15  ;;  %v996_v55 = vrot.slane %v856_v6, %v1449_v15 }
 0x140   : > { %v973_v53 = vcombine.low %v965_v49, %v972_v50 }
 0x141   : > { %v997_v56 = vcombine.low %v982_v52, %v989_v54  ;;  %v1011_v58 = vrot.slane %v996_v55, %v1449_v15 }
 0x142   : > { %1020 = vst.msk [vmem:[%s1565_s21 + $0x10] sm:$0x1f] %vm1017_vm11, %v973_v53 }
 0x143   : > { %v1004_v57 = vrot.slane %v997_v56, %v1449_v15 }
 0x145   : > { %v1012_v59 = vcombine.low %v1004_v57, %v1011_v58 }
 0x147   : > { %1021 = vst.msk [vmem:[%s1565_s21 + $0x18] sm:$0x1f] %vm1017_vm11, %v1012_v59 }
 0x148 PF: > { %p11_p8 = scmp.ge.s32.totalorder %s1356_s11, 4   ;;  %s1607_s6 = smov %s1308_s7 }
 0x149   : > { %s1608_s7 = smov %s1312_s8  ;;  %s1609_s8 = smov %s1366_s14 }
 0x14a   : > { %s1610_s9 = smov %s1356_s11  ;;  %13 = sbr.rel (!%p11_p8) target bundleno = 3 (0x3), region = 75 }
 0x151   :  { %1044 = vsyncpa [#allocation3], 1 }
 0x152   :  { %1046 = vsyncpa [#allocation3 + $0x1], 1 }

</bundles_post_ra>
